<compile_context>
chip_gen: v6e
topology: v6e:2x2x1
jax: 0.10.0
libtpu: 0.0.40
codegen_flags: <defaults>
</compile_context>

<pallas_src>
import jax
import jax.numpy as jnp
from jax.experimental import pallas as pl
from jax.experimental.pallas import tpu as pltpu


_SLAB = 512  # rows of output produced per in-kernel streaming step


def _select_tile(HW, B, hw_tile):
    """Pick the spatial (lane) tile: big, 128-aligned, balanced across steps."""
    hw_tile = max(128, (hw_tile // 128) * 128)
    # Keep >=2 total grid steps when B is small so v7x's second TensorCore
    # gets work (grid axes are both "parallel").
    min_hw_steps = 1 if B >= 2 else 2
    n_steps = max(min_hw_steps, pl.cdiv(HW, hw_tile))
    if n_steps <= 1:
        return HW                               # single full-extent block
    t = ((pl.cdiv(HW, n_steps) + 127) // 128) * 128   # balanced, 128-aligned
    if t >= HW:
        return HW
    return t


def _build_kernel(t_hw, c_out, mxu_dtype):
    """Kernel over one (C_in, t_hw) slab of one image."""
    chunked = (t_hw % 128 == 0) and (t_hw > _SLAB)
    if chunked:
        n_full = t_hw // _SLAB
        rem = t_hw - n_full * _SLAB             # multiple of 128 (possibly 0)

    def kernel(x_ref, w_ref, b_ref, o_ref):
        # x_ref: (C_in, t_hw)   channels on sublanes, spatial on lanes
        # w_ref: (C_in, C_out)  resident weight (W.T), already mxu_dtype
        # b_ref: (1, C_out)     f32 bias
        # o_ref: (t_hw, C_out)
        w = w_ref[...]
        b = b_ref[...].astype(jnp.float32)

        def compute_store(start, size):
            xs = x_ref[:, pl.ds(start, size)].astype(mxu_dtype)
            acc = jax.lax.dot_general(
                xs, w,
                dimension_numbers=(((0,), (0,)), ((), ())),  # contract C_in
                preferred_element_type=jnp.float32,
            )
            o_ref[pl.ds(start, size), :] = (acc + b).astype(o_ref.dtype)

        if not chunked:
            compute_store(0, t_hw)
        else:
            # Stream MXU results -> bias add -> cast -> store in 512-row slabs
            # so no (t_hw, C_out) f32 temporary is materialized in VMEM.
            def body(i, carry):
                compute_store(pl.multiple_of(i * _SLAB, _SLAB), _SLAB)
                return carry

            jax.lax.fori_loop(0, n_full, body, 0, unroll=(n_full <= 4))
            if rem:
                compute_store(n_full * _SLAB, rem)

    return kernel


def permute_linear(x_nchw, weight, bias, *, hw_tile=8192,
                   mxu_dtype=jnp.bfloat16, out_dtype=None):
    """x_nchw: (B, C_in, H, W); weight: (C_out, C_in); bias: (C_out,).

    Returns (B, H, W, C_out), matching torch's permute(0,2,3,1) + F.linear.
    `mxu_dtype` controls the matmul operand precision (bf16 recommended);
    accumulation is always f32.  `out_dtype` defaults to x's dtype.
    """
    B, C_in, H, W = x_nchw.shape
    C_out, C_in_w = weight.shape
    assert C_in_w == C_in, (C_in_w, C_in)
    HW = H * W
    out_dtype = x_nchw.dtype if out_dtype is None else out_dtype

    # Free reshapes / tiny one-time prep (no large HBM passes; x is NOT cast).
    x3d = x_nchw.reshape(B, C_in, HW)           # contiguous merge of H, W
    w_t = weight.T.astype(mxu_dtype)            # (C_in, C_out), ~9-18 KiB
    b2d = bias.reshape(1, C_out).astype(jnp.float32)

    t_hw = _select_tile(HW, B, hw_tile)
    grid = (B, pl.cdiv(HW, t_hw))
    kernel = _build_kernel(t_hw, C_out, mxu_dtype)

    out3d = pl.pallas_call(
        kernel,
        out_shape=jax.ShapeDtypeStruct((B, HW, C_out), out_dtype),
        grid_spec=pltpu.PrefetchScalarGridSpec(
            num_scalar_prefetch=0,
            grid=grid,
            in_specs=[
                # x: one image (batch squeezed), full C_in, t_hw spatial lanes
                pl.BlockSpec((None, C_in, t_hw), lambda b, j: (b, 0, j)),
                # weight / bias: constant block index -> resident, no re-DMA
                pl.BlockSpec((C_in, C_out), lambda b, j: (0, 0)),
                pl.BlockSpec((1, C_out), lambda b, j: (0, 0)),
            ],
            out_specs=pl.BlockSpec((None, t_hw, C_out), lambda b, j: (b, j, 0)),
        ),
        compiler_params=pltpu.CompilerParams(
            dimension_semantics=("parallel", "parallel"),
            # v5e's default scoped-VMEM limit (16 MiB) is too small for the
            # 8192-wide tile; 48 MiB covers it with headroom and stays under
            # v7x's 64 MiB physical VMEM.
            vmem_limit_bytes=48 * 1024 * 1024,
        ),
    )(x3d, w_t, b2d)

    # Free reshape: (B, H*W, C_out) -> (B, H, W, C_out) == torch output layout.
    return out3d.reshape(B, H, W, C_out)


if __name__ == "__main__":
    key = jax.random.PRNGKey(0)
    k_x, k_w, k_b, k_x2, k_x3 = jax.random.split(key, 5)

    C_in, C_out = 44, 101

    # Deterministic parameter init (PyTorch-style uniform bound 1/sqrt(fan_in)).
    bound = 1.0 / (C_in ** 0.5)
    weight = jax.random.uniform(k_w, (C_out, C_in), jnp.float32, -bound, bound)
    bias = jax.random.uniform(k_b, (C_out,), jnp.float32, -bound, bound)

    def ref_f32(x):
        v1 = jnp.transpose(x, (0, 2, 3, 1))
        return jnp.einsum("bhwc,oc->bhwo", v1, weight,
                          precision=jax.lax.Precision.HIGHEST) + bias

    def ref_mxu(x):
        # Same math the kernel performs: bf16-rounded operands, f32 accumulate.
        v1 = jnp.transpose(x, (0, 2, 3, 1)).astype(jnp.bfloat16).astype(jnp.float32)
        w = weight.astype(jnp.bfloat16).astype(jnp.float32)
        return jnp.einsum("bhwc,oc->bhwo", v1, w,
                          precision=jax.lax.Precision.HIGHEST) + bias

    def check(x, **kw):
        out = jax.block_until_ready(permute_linear(x, weight, bias, **kw))
        B, _, H, W = x.shape
        assert out.shape == (B, H, W, C_out), out.shape
        # Exact-math parity with the kernel's bf16-operand / f32-accumulate dot.
        assert jnp.allclose(out, ref_mxu(x), atol=1e-3, rtol=1e-3), \
            "mismatch vs bf16-operand reference"
        # Semantic fidelity vs the full-f32 torch reference (bf16 operand
        # rounding over K=44 bounds the error well below this tolerance).
        assert jnp.allclose(out, ref_f32(x), atol=5e-2, rtol=0.0), \
            "mismatch vs f32 reference"
        return out

    # Case 1: B=2, small spatial (8x8=64) -> one full-extent spatial tile per
    # image, grid=(2, 1); batch axis alone feeds both v7x TensorCores.
    check(jax.random.normal(k_x, (2, C_in, 8, 8), dtype=jnp.float32))

    # Case 2: B=1, ragged spatial (10x20=200) -> balanced >=2-step split for the
    # single-image case, exercising the partial-final-block (dropped OOB rows)
    # path with no jnp.pad.
    check(jax.random.normal(k_x2, (1, C_in, 10, 20), dtype=jnp.float32))

    # Case 3: B=1, 48x48=2304 -> balanced 1152-wide (128-aligned) tiles,
    # exercising the in-kernel 512-row streaming store loop plus its remainder
    # chunk and a partial final grid block.
    check(jax.random.normal(k_x3, (1, C_in, 48, 48), dtype=jnp.float32))

    print("KERNEL_OK")
</pallas_src>

<mosaic_0001>
module attributes {stable_mosaic.version = 11 : i64} {
  func.func @kernel(%arg0: i32, %arg1: i32, %arg2: memref<1x44x64xf32, #tpu.memory_space<vmem>>, %arg3: memref<44x101xbf16, #tpu.memory_space<vmem>>, %arg4: memref<1x101xf32, #tpu.memory_space<vmem>>, %arg5: memref<1x64x101xf32, #tpu.memory_space<vmem>>) attributes {dimension_semantics = [#tpu.dimension_semantics<parallel>, #tpu.dimension_semantics<parallel>], iteration_bounds = array<i64: 2, 1>, scalar_prefetch = 0 : i64, scratch_operands = 0 : i64, tpu.core_type = #tpu.core_type<tc>, window_params = [{transform_indices = @transform_0, window_bounds = array<i64: 1, 44, 64>}, {pipeline_mode = #tpu.pipeline_mode<synchronous>, transform_indices = @transform_1, window_bounds = array<i64: 44, 101>}, {pipeline_mode = #tpu.pipeline_mode<synchronous>, transform_indices = @transform_2, window_bounds = array<i64: 1, 101>}, {transform_indices = @transform_3, window_bounds = array<i64: 1, 64, 101>}]} {
    %c0 = arith.constant 0 : index
    %c0_0 = arith.constant 0 : index
    %0 = vector.load %arg3[%c0, %c0_0] : memref<44x101xbf16, #tpu.memory_space<vmem>>, vector<44x101xbf16>
    %c0_1 = arith.constant 0 : index
    %c0_2 = arith.constant 0 : index
    %1 = vector.load %arg4[%c0_1, %c0_2] : memref<1x101xf32, #tpu.memory_space<vmem>>, vector<1x101xf32>
    %c0_3 = arith.constant 0 : index
    %c0_4 = arith.constant 0 : index
    %c0_5 = arith.constant 0 : index
    %2 = vector.load %arg2[%c0_3, %c0_4, %c0_5] : memref<1x44x64xf32, #tpu.memory_space<vmem>>, vector<1x44x64xf32>
    %3 = vector.shape_cast %2 : vector<1x44x64xf32> to vector<44x64xf32>
    %4 = arith.truncf %3 : vector<44x64xf32> to vector<44x64xbf16>
    %cst = arith.constant dense<0.000000e+00> : vector<64x101xf32>
    %5 = tpu.matmul %4, %0, %cst {dimension_numbers = #tpu.dot_dimension_numbers<[0], [0], [1], [1], [0, 1, 1, 1], [], []>} : vector<44x64xbf16>, vector<44x101xbf16>, vector<64x101xf32> -> vector<64x101xf32>
    %6 = vector.broadcast %1 : vector<1x101xf32> to vector<64x101xf32>
    %7 = arith.addf %5, %6 : vector<64x101xf32>
    %c0_6 = arith.constant 0 : index
    %c0_7 = arith.constant 0 : index
    %c0_8 = arith.constant 0 : index
    %8 = vector.load %arg5[%c0_6, %c0_7, %c0_8] : memref<1x64x101xf32, #tpu.memory_space<vmem>>, vector<1x64x101xf32>
    %9 = vector.shape_cast %8 : vector<1x64x101xf32> to vector<64x101xf32>
    %10 = vector.shape_cast %7 : vector<64x101xf32> to vector<1x64x101xf32>
    tpu.vector_store %arg5[%c0_6, %c0_7, %c0_8], %10 {strides = array<i32>} : memref<1x64x101xf32, #tpu.memory_space<vmem>>, vector<1x64x101xf32>,
    return
  }
  func.func @transform_0(%arg0: i32, %arg1: i32) -> (i32, i32, i32) {
    %c0_i32 = arith.constant 0 : i32
    %c0_i32_0 = arith.constant 0 : i32
    return %arg0, %c0_i32, %arg1 : i32, i32, i32
  }
  func.func @transform_1(%arg0: i32, %arg1: i32) -> (i32, i32) {
    %c0_i32 = arith.constant 0 : i32
    %c0_i32_0 = arith.constant 0 : i32
    %c0_i32_1 = arith.constant 0 : i32
    return %c0_i32, %c0_i32_0 : i32, i32
  }
  func.func @transform_2(%arg0: i32, %arg1: i32) -> (i32, i32) {
    %c0_i32 = arith.constant 0 : i32
    %c0_i32_0 = arith.constant 0 : i32
    %c0_i32_1 = arith.constant 0 : i32
    return %c0_i32, %c0_i32_0 : i32, i32
  }
  func.func @transform_3(%arg0: i32, %arg1: i32) -> (i32, i32, i32) {
    %c0_i32 = arith.constant 0 : i32
    %c0_i32_0 = arith.constant 0 : i32
    return %arg0, %arg1, %c0_i32 : i32, i32, i32
  }
}

</mosaic_0001>

<bundles_post_ra>
// kernel: tpu_custom_call.1
= control target key start
LH: loop header
LB: loop body
LE: loop exit
PB: predicated region body
PF: predicated region fallthrough
CT: control target
= control target key end

     0   :  { %8 = vsyncpa [#allocation3], 0  ;;  %s788_s0 = inlined_call_operand.vmem [shape: f32[2,44,64], index: 0, kind: input, shape index: {}]   ;;  %s789_s1 = inlined_call_operand.vmem [shape: bf16[44,101], index: 1, kind: input, shape index: {}]   ;;  %s790_s2 = inlined_call_operand.vmem [shape: f32[1,101], index: 2, kind: input, shape index: {}]   ;;  %s791_s3 = inlined_call_operand.hbm [shape: f32[2,64,101], index: 3, kind: output, shape index: {}]  }
   0x1   :  { %10 = vsyncpa [#allocation3 + $0x1], 0  ;;  %s650_s12 = smov 0   ;;  %s652_s13 = smov 0  }
   0x2   :  { %s654_s14 = smov 0   ;;  %s656_s15 = smov 0  }
   0x3   :  { %s658_s16 = smov 0   ;;  %s660_s17 = smov 0  }
   0x4 LB: > { %s437_s18 = sadd.s32 4294967295, %s625_s17   ;;  %s438_s19 = sadd.s32 4294967294, %s625_s17   ;;  %s625_s17 = sphi %s660_s17, %s16_s17   ;;  %s621_s16 = sphi %s658_s16, %s798_s16   ;;  %s617_s15 = sphi %s656_s15, %s797_s15   ;;  %s613_s14 = sphi %s654_s14, %s796_s14   ;;  %s609_s13 = sphi %s652_s13, %s795_s13   ;;  %s605_s12 = sphi %s650_s12, %s794_s12  }
   0x5   : > { %s28_s20 = sadd.s32 1, %s621_s16  ;;  %s107_s21 = sadd.s32 1, %s613_s14 }
   0x6   : > { %p30_p0 = scmp.ge.s32.totalorder %s28_s20, 2  ;;  %p117_p1 = scmp.ne.s32.totalorder %s613_s14, %s609_s13 }
   0x7   : > { %p118_p2 = scmp.eq.s32.totalorder %s437_s18, 1  ;;  %p123_p3 = scmp.ne.s32.totalorder %s609_s13, %s605_s12 }
   0x8   : > { %s800_s20 = smov (%p30_p0, %s28_s20), 0  ;;  %p124_p5 = scmp.eq.s32.totalorder %s438_s19, 1 }
   0x9   : > { %p690_p4 = por %p118_p2, %p117_p1  ;;  %s102_s23 = ssub.s32 %s621_s16, %s800_s20 }
   0xa   : > { %p441_p6 = scmp.ge.s32.totalorder %s625_s17, 1  ;;  %p105_p7 = scmp.eq.s32.totalorder %s102_s23, 0 }
   0xb   : > { %p697_p8 = por %p124_p5, %p123_p3  ;;  %p159_p9 = scmp.lt.s32.totalorder %s625_s17, 3 }
   0xc   : > { %s703_s25 = scalar_select %p105_p7, %s613_s14, %s107_s21  }
   0xd   : > { %p160_p10 = pnand %p441_p6, %p159_p9 }
   0xe   : > { %p186_p11 = scmp.lt.s32.totalorder (!%p160_p10), %s617_s15, 1  ;;  %s183_s10 = sand.u32 (!%p160_p10), 1, %s609_s13  }
   0xf   : > { %163 = sbr.rel (%p160_p10) target bundleno = 354 (0x162), region = 32  ;;  %s442_s11 = sshll.u32 (!%p160_p10), %s183_s10, 6 }
  0x10   : > { %s185_s21 = scalar_lea.vmem (!%p160_p10), [#allocation2], %s442_s11  ;;  %s457_s23 = sshll.u32 (!%p160_p10), %s617_s15, 10 }
  0x11   : > { %s358_s26 = sshll.u32 (!%p160_p10), %s185_s21, 4  ;;  %s735_s29 = scalar_lea.hbm (!%p160_p10), %s791_s3, %s457_s23  ;;  %s737_s26 = int_to_ptr.vmem [resolvable:$true] %s358_s26 }
  0x14   : > { %v546_v0 = vld [vmem:[%s789_s1 + $0x10] sm:$0x3f]   ;;  %vm264_vm0 = vcmask 1045504   ;;  %v547_v1 = vld [vmem:[%s789_s1 + $0x8] sm:$0xff]   ;;  %s187_s30 = scalar_select %p186_p11, %s617_s15, 1  ;;  %v548_v3 = vld [vmem:[%s789_s1] sm:$0xff]  }
  0x15   : > { %485 = vmatprep.subr.msk.bf16.mxu0 %vm264_vm0, %v546_v0  ;;  %v266_v2 = vsel %vm264_vm0, %v546_v0, 0  ;;  %486 = vmatprep.subr.msk.bf16.mxu1 %vm264_vm0, %v546_v0  ;;  %vm251_vm1 = vcmask 359424   ;;  %v444_v17 = vld [vmem:[%s790_s2] ss:$0 sm:$0xff]  ;;  %vm333_vm2 = vcmask 826368   ;;  %s743_s15 = scalar_lea.sflag [#allocation3], %s183_s10 }
  0x16   : > { %s487_s4 = smul.u32 48, %s187_s30  ;;  %466 = vmatpush3.bf16.msra.mxu0 %v266_v2  ;;  %482 = vmatpush3.bf16.msra.mxu1 %v266_v2  ;;  %s549_s30 = scalar_lea.vmem %s737_s26, 1024 }
  0x17   : > { %467 = vmatprep.subr.bf16.mxu0 %v547_v1  ;;  %480 = vmatprep.subr.bf16.mxu1 %v547_v1  ;;  %p550_p12 = scmp.ne.s32.totalorder %s737_s26, %s549_s30 }
  0x18   : > { %s193_s9 = scalar_lea.vmem %s788_s0, %s487_s4  ;;  %s627_s4 = smov [#allocation2]  }
  0x19   : > { %v203_v4 = vld [vmem:[%s193_s9] sm:$0xff]  ;;  %v204_v5 = vld [vmem:[%s193_s9 + $0x8] sm:$0xff]  ;;  %v205_v6 = vld [vmem:[%s193_s9 + $0x10] sm:$0xff]  ;;  %p551_p13 = pnand %p550_p12, %p690_p4  ;;  %s553_s5 = sshll.u32 %s627_s4, 4  ;;  %s554_s5 = int_to_ptr.vmem [resolvable:$false] %s553_s5 }
  0x1a   : > { %v209_v7 = vpack.c.bf16 %v204_v5, %v203_v4  ;;  %v206_v8 = vld [vmem:[%s193_s9 + $0x18] sm:$0xff]  ;;  %468 = vmatpush3.bf16.msra.mxu0 %v547_v1  ;;  %483 = vmatpush3.bf16.msra.mxu1 %v547_v1  ;;  %v207_v10 = vld [vmem:[%s193_s9 + $0x20] sm:$0xff]  ;;  %v208_v11 = vld [vmem:[%s193_s9 + $0x28] sm:$0xf]  ;;  %s555_s6 = scalar_lea.vmem %s554_s5, 2048  ;;  %p556_p1 = scmp.lt.s32.totalorder %s737_s26, %s554_s5 }
  0x1b   : > { %469 = vmatprep.subr.bf16.mxu0 %v548_v3  ;;  %481 = vmatprep.subr.bf16.mxu1 %v548_v3  ;;  %v210_v9 = vpack.c.bf16 %v206_v8, %v205_v6  ;;  %v211_v12 = vpack.c.bf16 %v208_v11, %v207_v10  ;;  %p552_p0 = pneg %p551_p13  ;;  %p557_p2 = scmp.lt.s32.totalorder %s555_s6, %s549_s30 }
  0x1c   : > { %218 = vxpose.xlu0.c.b16.start [1/3] (short) (narrow) %v209_v7, 64 }
  0x1d   : > { %p558_p3 = por %p557_p2, %p556_p1 }
  0x1e   : > { %470 = vmatpush3.bf16.msra.mxu0 %v548_v3  ;;  %484 = vmatpush3.bf16.msra.mxu1 %v548_v3 }
  0x1f   : > { %p559_p5 = pnand %p558_p3, %p552_p0 }
  0x20   : > { %219 = vxpose.xlu0.c.b16.cont [2/3] (short) (narrow) %v210_v9, 64 }
  0x24   : > { %220 = vxpose.xlu0.c.b16.end [3/3] (short) (narrow) %v211_v12, 64 }
  0x7e   : > { %v226_v13 = vpop.trf.xlu0 }
  0x7f   : > { %471 = vmatprep.mubr.msk.bf16.mxu0 %vm251_vm1, %v226_v13 }
  0x82   : > { %v227_v14 = vpop.trf.xlu0 }
  0x83   : > { %472 = vmatmul.mubr.msk.bf16.vlgmr.msra.gmra.mxu0 %vm251_vm1, %v227_v14 }
  0x86   : > { %v228_v15 = vpop.trf.xlu0 }
  0x87   : > { %475 = vmatprep.mubr.msk.bf16.mxu1 %vm251_vm1, %v228_v15 }
  0x8a   : > { %v229_v16 = vpop.trf.xlu0 }
  0x8b   : > { %476 = vmatmul.mubr.msk.bf16.vlgmr.msra.gmra.mxu1 %vm251_vm1, %v229_v16 }
 0x143   : > { %v473_v18 = vpop.f32.mrf.mxu0 }
 0x144   : > { %v311_v19 = vadd.f32 %v473_v18, %v444_v17 }
 0x145   : > { %v302_v20 = vpop.f32.mrf.mxu0 }
 0x146   : > { %336 = vst.msk [vmem:[%s185_s21 + $0x10] sm:$0xff] %vm333_vm2, %v311_v19  ;;  %v303_v21 = vadd.f32 %v444_v17, %v302_v20 }
 0x147   : > { %v474_v22 = vpop.f32.mrf.mxu0 }
 0x148   : > { %334 = vst.msk [vmem:[%s185_s21] sm:$0xff] %vm333_vm2, %v303_v21  ;;  %v314_v23 = vadd.f32 %v474_v22, %v444_v17 }
 0x149   : > { %v305_v24 = vpop.f32.mrf.mxu0 }
 0x14a   : > { %337 = vst.msk [vmem:[%s185_s21 + $0x18] sm:$0xff] %vm333_vm2, %v314_v23  ;;  %v306_v25 = vadd.f32 %v444_v17, %v305_v24 }
 0x14b   : > { %v477_v26 = vpop.f32.mrf.mxu1 }
 0x14c   : > { %335 = vst.msk [vmem:[%s185_s21 + $0x8] sm:$0xff] %vm333_vm2, %v306_v25  ;;  %v327_v27 = vadd.f32 %v477_v26, %v444_v17 }
 0x14d   : > { %v318_v28 = vpop.f32.mrf.mxu1 }
 0x14e   : > { %340 = vst.msk [vmem:[%s185_s21 + $0x30] sm:$0xff] %vm333_vm2, %v327_v27  ;;  %v319_v29 = vadd.f32 %v444_v17, %v318_v28 }
 0x14f   : > { %v478_v30 = vpop.f32.mrf.mxu1 }
 0x150   : > { %338 = vst.msk [vmem:[%s185_s21 + $0x20] sm:$0xff] %vm333_vm2, %v319_v29  ;;  %v330_v31 = vadd.f32 %v478_v30, %v444_v17 }
 0x151   : > { %v321_v32 = vpop.f32.mrf.mxu1 }
 0x152   : > { %341 = vst.msk [vmem:[%s185_s21 + $0x38] sm:$0xff] %vm333_vm2, %v330_v31  ;;  %v322_v33 = vadd.f32 %v444_v17, %v321_v32 }
 0x154   : > { %339 = vst.msk [vmem:[%s185_s21 + $0x28] sm:$0xff] %vm333_vm2, %v322_v33 }
 0x155   : > { %562 = shalt.err (!%p559_p5)
}
 0x156   : > { %s563_s7 = scalar_lea.hbm %s735_s29, 1024  ;;  %s567_s10 = scalar_lea.hbm %s791_s3, 2048 }
 0x157   : > { %p564_p6 = scmp.ne.s32.totalorder %s735_s29, %s563_s7  ;;  %p568_p10 = scmp.lt.s32.totalorder %s735_s29, %s791_s3 }
 0x158   : > { %p569_p11 = scmp.lt.s32.totalorder %s567_s10, %s563_s7 }
 0x159   : > { %p565_p7 = pnand %p564_p6, %p690_p4 }
 0x15a   : > { %p570_p12 = por %p569_p11, %p568_p10 }
 0x15b   : > { %p566_p9 = pneg %p565_p7 }
 0x15d   : > { %p571_p13 = pnand %p570_p12, %p566_p9 }
 0x15f   : > { %574 = shalt.err (!%p571_p13)
}
 0x160   : > { %s628_s19 = smov 128   ;;  %s629_s21 = smov 8  }
 0x161   : > { %488 = dma.vmem_to_hbm [thread:$0]  (%p690_p4), %s737_s26, 1024, %s735_s29, %s743_s15, %s628_s19, %s628_s19, %s629_s21  }
 0x162 PF: > { %p494_p0 = scmp.ge.s32.totalorder %s625_s17, 2  ;;  %s373_s23 = sand.u32 1, %s605_s12  }
 0x163   : > { %s374_s27 = scalar_lea.sflag [#allocation3], %s373_s23 }
 0x164   : > { %p491_p1 = pnand %p494_p0, %p697_p8 }
 0x166   : > { %p492_p2 = pneg %p491_p1 }
 0x168   : > { %600 = dma.done.wait (%p492_p2), %s374_s27, 1024  }
 0x169   : > { %602 = vsyncadd (%p492_p2), %s374_s27, 4294966272  ;;  %s16_s17 = sadd.s32 1, %s625_s17   ;;  %s794_s12 = smov %s609_s13 }
 0x16a   : > { %p13_p3 = scmp.ge.s32.totalorder %s16_s17, 4   ;;  %s795_s13 = smov %s613_s14 }
 0x16b   : > { %s796_s14 = smov %s703_s25  ;;  %s797_s15 = smov %s621_s16 }
 0x16c   : > { %s798_s16 = smov %s800_s20  ;;  %15 = sbr.rel (!%p13_p3) target bundleno = 4 (0x4), region = 67 }
 0x171   :  { %379 = vsyncpa [#allocation3], 1 }
 0x172   :  { %381 = vsyncpa [#allocation3 + $0x1], 1 }

</bundles_post_ra>
